<compile_context>
chip_gen: v7x
topology: tpu7x:2x2x1
jax: 0.10.0
libtpu: 0.0.40
codegen_flags: <defaults>
</compile_context>

<pallas_src>
from functools import partial

import jax
import jax.numpy as jnp
from jax import lax
from jax.experimental import pallas as pl
from jax.experimental.pallas import tpu as pltpu


# Lanes per grid step.  One step covers 8 * TILE_L = 32768 batch elements.
# Per-step VMEM (double-buffered in + out) ~= 1280 * TILE_L bytes ~= 5 MiB,
# which fits v5e's 16 MiB scoped default and v7x's 64 MiB physical VMEM.
# Batches >= 65536 give >= 2 grid steps so both v7x TensorCores get work.
TILE_L = 4096


def _silu(v):
    # x * sigmoid(x).  lax.logistic is the numerically stable sigmoid; its exp
    # lowers to the EUP (a free issue slot alongside the VPU MACs).
    return v * lax.logistic(v)


def paramnet_kernel(theta_ref, x_ref, o_ref, *, tot_params):
    """One batch tile: x_ref (8, T) -> o_ref (tot_params, 8, T).

    Batch occupies the sublane (8) and lane (T) axes, so every vreg is full.

    theta_ref : SMEM f32[13 + 2*tot_params] =
        [w1(2), b1(2), w2(4, row-major (in,out)), b2(2), w3(2), b3(1),
         w4(tot_params), b4(tot_params)]
    """
    x = x_ref[...]                                                  # (8, T)

    # Layer 1: Linear(1, 2) + SiLU  (bias fused into the MAC).
    h10 = _silu(x * theta_ref[0] + theta_ref[2])
    h11 = _silu(x * theta_ref[1] + theta_ref[3])

    # Layer 2: Linear(2, 2) + SiLU.  w2[k, j] stored row-major (in, out).
    h20 = _silu(h10 * theta_ref[4] + h11 * theta_ref[6] + theta_ref[8])
    h21 = _silu(h10 * theta_ref[5] + h11 * theta_ref[7] + theta_ref[9])

    # Layer 3: Linear(2, 1) + SiLU.
    h3 = _silu(h20 * theta_ref[10] + h21 * theta_ref[11] + theta_ref[12])

    # Layer 4: Linear(1, tot_params) as tot_params scalar-broadcast MACs,
    # each writing one dense (8, T) output row (unmasked vst).
    for j in range(tot_params):
        o_ref[j] = h3 * theta_ref[13 + j] + theta_ref[13 + tot_params + j]


def paramnet_forward_lanes(x, params, *, tile_l=TILE_L):
    """Preferred entry point: returns (tot_params, B), batch on the lane-dense
    trailing axis (no transpose anywhere)."""
    B, n_in = x.shape
    assert n_in == 1, "ParamNet has N_in=1"
    tot_params = params["w4"].shape[1]

    # Fold batch across 8 sublanes x L lanes.  Batch index b -> (b // L, b % L).
    lanes_needed = pl.cdiv(B, 8)
    if lanes_needed <= tile_l:
        # Small-B fast path: single grid step, minimal lane width (multiple of 128).
        tile_l = max(128, 128 * pl.cdiv(lanes_needed, 128))
    n_blocks = pl.cdiv(lanes_needed, tile_l)
    L = n_blocks * tile_l
    bp = 8 * L

    x_flat = jnp.zeros((bp,), jnp.float32).at[:B].set(x[:, 0].astype(jnp.float32))
    x_folded = x_flat.reshape(8, L)        # free row-major reshape

    # All parameters flattened into one SMEM scalar vector (51 floats).
    theta = jnp.concatenate([
        params["w1"].reshape(-1), params["b1"].reshape(-1),
        params["w2"].reshape(-1), params["b2"].reshape(-1),
        params["w3"].reshape(-1), params["b3"].reshape(-1),
        params["w4"].reshape(-1), params["b4"].reshape(-1),
    ]).astype(jnp.float32)                 # (13 + 2*tot_params,)

    out_folded = pl.pallas_call(
        partial(paramnet_kernel, tot_params=tot_params),
        out_shape=jax.ShapeDtypeStruct((tot_params, 8, L), jnp.float32),
        grid=(n_blocks,),
        in_specs=[
            pl.BlockSpec(memory_space=pltpu.MemorySpace.SMEM),       # theta (whole, SMEM)
            pl.BlockSpec((8, tile_l), lambda i: (0, i)),             # x tile (sublane+lane dense)
        ],
        out_specs=pl.BlockSpec((tot_params, 8, tile_l), lambda i: (0, 0, i)),
        compiler_params=pltpu.CompilerParams(
            dimension_semantics=("parallel",)),                      # megacore / v7x 2 TCs
    )(theta, x_folded)

    # (tot_params, 8, L) -> (tot_params, 8*L) is a free row-major reshape;
    # batch element b sits at [:, b].  Drop padding (padded lanes hold finite
    # garbage from the bias chains, sliced off here).
    return out_folded.reshape(tot_params, bp)[:, :B]


def paramnet_forward(x, params, **kw):
    """Torch-module-compatible output: (B, tot_params).

    NOTE: the transpose is a separate mem-bound XLA op (~2x the kernel's own
    HBM write traffic); prefer paramnet_forward_lanes when the consumer can
    accept the batch-last layout.
    """
    return paramnet_forward_lanes(x, params, **kw).T


def init_params(key, N_in=1, N_t=2, L_s=3, N_s=2):
    """Deterministic init mimicking torch.nn.Linear's U(-1/sqrt(fan_in), 1/sqrt(fan_in))."""
    tot_params = (L_s - 1) * (N_s + 1) * N_s + 3 * N_s + 1  # = 19
    dims = [(N_in, N_t), (N_t, N_t), (N_t, 1), (1, tot_params)]
    params = {}
    for i, (fan_in, fan_out) in enumerate(dims, start=1):
        key, kw, kb = jax.random.split(key, 3)
        bound = 1.0 / jnp.sqrt(jnp.float32(fan_in))
        params[f"w{i}"] = jax.random.uniform(kw, (fan_in, fan_out), jnp.float32,
                                             minval=-bound, maxval=bound)
        params[f"b{i}"] = jax.random.uniform(kb, (1, fan_out), jnp.float32,
                                             minval=-bound, maxval=bound)
    return params, tot_params


def paramnet_reference(x, p):
    silu = lambda v: v * jax.nn.sigmoid(v)
    h = silu(x @ p["w1"] + p["b1"])
    h = silu(h @ p["w2"] + p["b2"])
    h = silu(h @ p["w3"] + p["b3"])
    return h @ p["w4"] + p["b4"]


if __name__ == "__main__":
    key = jax.random.PRNGKey(0)
    k_params, k_x = jax.random.split(key)

    params, tot_params = init_params(k_params)

    B, N_in = 2500, 1
    x = jax.random.normal(k_x, (B, N_in), dtype=jnp.float32)
    ref = paramnet_reference(x, params)

    # 1) Lane-dense primary path (single-block small-B fast path here).
    out_lanes = paramnet_forward_lanes(x, params)
    out_lanes = jax.block_until_ready(out_lanes)
    assert out_lanes.shape == (tot_params, B)
    assert jnp.allclose(out_lanes, ref.T, atol=1e-4, rtol=1e-4), "lane-dense mismatch"

    # 2) Torch-compatible layout, forcing a multi-step grid (tile_l=128 -> 3 steps)
    #    to exercise the tiled/pipelined path as well.
    out = paramnet_forward(x, params, tile_l=128)
    out = jax.block_until_ready(out)
    assert out.shape == (B, tot_params)
    assert jnp.allclose(out, ref, atol=1e-4, rtol=1e-4), "tiled path mismatch"

    print("KERNEL_OK")
</pallas_src>

<mosaic_0001>
module attributes {stable_mosaic.version = 11 : i64} {
  func.func @paramnet_kernel(%arg0: i32, %arg1: memref<51xf32, #tpu.memory_space<smem>>, %arg2: memref<8x384xf32, #tpu.memory_space<vmem>>, %arg3: memref<19x8x384xf32, #tpu.memory_space<vmem>>) attributes {dimension_semantics = [#tpu.dimension_semantics<parallel>], iteration_bounds = array<i64: 1>, scalar_prefetch = 0 : i64, scratch_operands = 0 : i64, tpu.core_type = #tpu.core_type<tc>, window_params = [{transform_indices = @transform_0, window_bounds = array<i64: 51>}, {transform_indices = @transform_1, window_bounds = array<i64: 8, 384>}, {transform_indices = @transform_2, window_bounds = array<i64: 19, 8, 384>}]} {
    %c0 = arith.constant 0 : index
    %c0_0 = arith.constant 0 : index
    %0 = vector.load %arg2[%c0, %c0_0] : memref<8x384xf32, #tpu.memory_space<vmem>>, vector<8x384xf32>
    %c0_1 = arith.constant 0 : index
    %1 = memref.load %arg1[%c0_1] : memref<51xf32, #tpu.memory_space<smem>>
    %2 = vector.broadcast %1 : f32 to vector<8x384xf32>
    %3 = arith.mulf %0, %2 : vector<8x384xf32>
    %c2 = arith.constant 2 : index
    %4 = memref.load %arg1[%c2] : memref<51xf32, #tpu.memory_space<smem>>
    %5 = vector.broadcast %4 : f32 to vector<8x384xf32>
    %6 = arith.addf %3, %5 : vector<8x384xf32>
    %7 = arith.negf %6 : vector<8x384xf32>
    %8 = math.exp %7 : vector<8x384xf32>
    %cst = arith.constant 1.000000e+00 : f32
    %9 = vector.broadcast %cst : f32 to vector<8x384xf32>
    %10 = arith.addf %9, %8 : vector<8x384xf32>
    %11 = arith.divf %9, %10 : vector<8x384xf32>
    %12 = arith.mulf %6, %11 : vector<8x384xf32>
    %c1 = arith.constant 1 : index
    %13 = memref.load %arg1[%c1] : memref<51xf32, #tpu.memory_space<smem>>
    %14 = vector.broadcast %13 : f32 to vector<8x384xf32>
    %15 = arith.mulf %0, %14 : vector<8x384xf32>
    %c3 = arith.constant 3 : index
    %16 = memref.load %arg1[%c3] : memref<51xf32, #tpu.memory_space<smem>>
    %17 = vector.broadcast %16 : f32 to vector<8x384xf32>
    %18 = arith.addf %15, %17 : vector<8x384xf32>
    %19 = arith.negf %18 : vector<8x384xf32>
    %20 = math.exp %19 : vector<8x384xf32>
    %cst_2 = arith.constant 1.000000e+00 : f32
    %21 = vector.broadcast %cst_2 : f32 to vector<8x384xf32>
    %22 = arith.addf %21, %20 : vector<8x384xf32>
    %23 = arith.divf %21, %22 : vector<8x384xf32>
    %24 = arith.mulf %18, %23 : vector<8x384xf32>
    %c4 = arith.constant 4 : index
    %25 = memref.load %arg1[%c4] : memref<51xf32, #tpu.memory_space<smem>>
    %26 = vector.broadcast %25 : f32 to vector<8x384xf32>
    %27 = arith.mulf %12, %26 : vector<8x384xf32>
    %c6 = arith.constant 6 : index
    %28 = memref.load %arg1[%c6] : memref<51xf32, #tpu.memory_space<smem>>
    %29 = vector.broadcast %28 : f32 to vector<8x384xf32>
    %30 = arith.mulf %24, %29 : vector<8x384xf32>
    %31 = arith.addf %27, %30 : vector<8x384xf32>
    %c8 = arith.constant 8 : index
    %32 = memref.load %arg1[%c8] : memref<51xf32, #tpu.memory_space<smem>>
    %33 = vector.broadcast %32 : f32 to vector<8x384xf32>
    %34 = arith.addf %31, %33 : vector<8x384xf32>
    %35 = arith.negf %34 : vector<8x384xf32>
    %36 = math.exp %35 : vector<8x384xf32>
    %cst_3 = arith.constant 1.000000e+00 : f32
    %37 = vector.broadcast %cst_3 : f32 to vector<8x384xf32>
    %38 = arith.addf %37, %36 : vector<8x384xf32>
    %39 = arith.divf %37, %38 : vector<8x384xf32>
    %40 = arith.mulf %34, %39 : vector<8x384xf32>
    %c5 = arith.constant 5 : index
    %41 = memref.load %arg1[%c5] : memref<51xf32, #tpu.memory_space<smem>>
    %42 = vector.broadcast %41 : f32 to vector<8x384xf32>
    %43 = arith.mulf %12, %42 : vector<8x384xf32>
    %c7 = arith.constant 7 : index
    %44 = memref.load %arg1[%c7] : memref<51xf32, #tpu.memory_space<smem>>
    %45 = vector.broadcast %44 : f32 to vector<8x384xf32>
    %46 = arith.mulf %24, %45 : vector<8x384xf32>
    %47 = arith.addf %43, %46 : vector<8x384xf32>
    %c9 = arith.constant 9 : index
    %48 = memref.load %arg1[%c9] : memref<51xf32, #tpu.memory_space<smem>>
    %49 = vector.broadcast %48 : f32 to vector<8x384xf32>
    %50 = arith.addf %47, %49 : vector<8x384xf32>
    %51 = arith.negf %50 : vector<8x384xf32>
    %52 = math.exp %51 : vector<8x384xf32>
    %cst_4 = arith.constant 1.000000e+00 : f32
    %53 = vector.broadcast %cst_4 : f32 to vector<8x384xf32>
    %54 = arith.addf %53, %52 : vector<8x384xf32>
    %55 = arith.divf %53, %54 : vector<8x384xf32>
    %56 = arith.mulf %50, %55 : vector<8x384xf32>
    %c10 = arith.constant 10 : index
    %57 = memref.load %arg1[%c10] : memref<51xf32, #tpu.memory_space<smem>>
    %58 = vector.broadcast %57 : f32 to vector<8x384xf32>
    %59 = arith.mulf %40, %58 : vector<8x384xf32>
    %c11 = arith.constant 11 : index
    %60 = memref.load %arg1[%c11] : memref<51xf32, #tpu.memory_space<smem>>
    %61 = vector.broadcast %60 : f32 to vector<8x384xf32>
    %62 = arith.mulf %56, %61 : vector<8x384xf32>
    %63 = arith.addf %59, %62 : vector<8x384xf32>
    %c12 = arith.constant 12 : index
    %64 = memref.load %arg1[%c12] : memref<51xf32, #tpu.memory_space<smem>>
    %65 = vector.broadcast %64 : f32 to vector<8x384xf32>
    %66 = arith.addf %63, %65 : vector<8x384xf32>
    %67 = arith.negf %66 : vector<8x384xf32>
    %68 = math.exp %67 : vector<8x384xf32>
    %cst_5 = arith.constant 1.000000e+00 : f32
    %69 = vector.broadcast %cst_5 : f32 to vector<8x384xf32>
    %70 = arith.addf %69, %68 : vector<8x384xf32>
    %71 = arith.divf %69, %70 : vector<8x384xf32>
    %72 = arith.mulf %66, %71 : vector<8x384xf32>
    %c13 = arith.constant 13 : index
    %73 = memref.load %arg1[%c13] : memref<51xf32, #tpu.memory_space<smem>>
    %74 = vector.broadcast %73 : f32 to vector<8x384xf32>
    %75 = arith.mulf %72, %74 : vector<8x384xf32>
    %c32 = arith.constant 32 : index
    %76 = memref.load %arg1[%c32] : memref<51xf32, #tpu.memory_space<smem>>
    %77 = vector.broadcast %76 : f32 to vector<8x384xf32>
    %78 = arith.addf %75, %77 : vector<8x384xf32>
    %c0_6 = arith.constant 0 : index
    %c0_7 = arith.constant 0 : index
    %c0_8 = arith.constant 0 : index
    %79 = vector.load %arg3[%c0_6, %c0_7, %c0_8] : memref<19x8x384xf32, #tpu.memory_space<vmem>>, vector<1x8x384xf32>
    %80 = vector.shape_cast %79 : vector<1x8x384xf32> to vector<8x384xf32>
    %81 = vector.shape_cast %78 : vector<8x384xf32> to vector<1x8x384xf32>
    tpu.vector_store %arg3[%c0_6, %c0_7, %c0_8], %81 {strides = array<i32>} : memref<19x8x384xf32, #tpu.memory_space<vmem>>, vector<1x8x384xf32>,
    %c14 = arith.constant 14 : index
    %82 = memref.load %arg1[%c14] : memref<51xf32, #tpu.memory_space<smem>>
    %83 = vector.broadcast %82 : f32 to vector<8x384xf32>
    %84 = arith.mulf %72, %83 : vector<8x384xf32>
    %c33 = arith.constant 33 : index
    %85 = memref.load %arg1[%c33] : memref<51xf32, #tpu.memory_space<smem>>
    %86 = vector.broadcast %85 : f32 to vector<8x384xf32>
    %87 = arith.addf %84, %86 : vector<8x384xf32>
    %c1_9 = arith.constant 1 : index
    %c0_10 = arith.constant 0 : index
    %c0_11 = arith.constant 0 : index
    %88 = vector.load %arg3[%c1_9, %c0_10, %c0_11] : memref<19x8x384xf32, #tpu.memory_space<vmem>>, vector<1x8x384xf32>
    %89 = vector.shape_cast %88 : vector<1x8x384xf32> to vector<8x384xf32>
    %90 = vector.shape_cast %87 : vector<8x384xf32> to vector<1x8x384xf32>
    tpu.vector_store %arg3[%c1_9, %c0_10, %c0_11], %90 {strides = array<i32>} : memref<19x8x384xf32, #tpu.memory_space<vmem>>, vector<1x8x384xf32>,
    %c15 = arith.constant 15 : index
    %91 = memref.load %arg1[%c15] : memref<51xf32, #tpu.memory_space<smem>>
    %92 = vector.broadcast %91 : f32 to vector<8x384xf32>
    %93 = arith.mulf %72, %92 : vector<8x384xf32>
    %c34 = arith.constant 34 : index
    %94 = memref.load %arg1[%c34] : memref<51xf32, #tpu.memory_space<smem>>
    %95 = vector.broadcast %94 : f32 to vector<8x384xf32>
    %96 = arith.addf %93, %95 : vector<8x384xf32>
    %c2_12 = arith.constant 2 : index
    %c0_13 = arith.constant 0 : index
    %c0_14 = arith.constant 0 : index
    %97 = vector.load %arg3[%c2_12, %c0_13, %c0_14] : memref<19x8x384xf32, #tpu.memory_space<vmem>>, vector<1x8x384xf32>
    %98 = vector.shape_cast %97 : vector<1x8x384xf32> to vector<8x384xf32>
    %99 = vector.shape_cast %96 : vector<8x384xf32> to vector<1x8x384xf32>
    tpu.vector_store %arg3[%c2_12, %c0_13, %c0_14], %99 {strides = array<i32>} : memref<19x8x384xf32, #tpu.memory_space<vmem>>, vector<1x8x384xf32>,
    %c16 = arith.constant 16 : index
    %100 = memref.load %arg1[%c16] : memref<51xf32, #tpu.memory_space<smem>>
    %101 = vector.broadcast %100 : f32 to vector<8x384xf32>
    %102 = arith.mulf %72, %101 : vector<8x384xf32>
    %c35 = arith.constant 35 : index
    %103 = memref.load %arg1[%c35] : memref<51xf32, #tpu.memory_space<smem>>
    %104 = vector.broadcast %103 : f32 to vector<8x384xf32>
    %105 = arith.addf %102, %104 : vector<8x384xf32>
    %c3_15 = arith.constant 3 : index
    %c0_16 = arith.constant 0 : index
    %c0_17 = arith.constant 0 : index
    %106 = vector.load %arg3[%c3_15, %c0_16, %c0_17] : memref<19x8x384xf32, #tpu.memory_space<vmem>>, vector<1x8x384xf32>
    %107 = vector.shape_cast %106 : vector<1x8x384xf32> to vector<8x384xf32>
    %108 = vector.shape_cast %105 : vector<8x384xf32> to vector<1x8x384xf32>
    tpu.vector_store %arg3[%c3_15, %c0_16, %c0_17], %108 {strides = array<i32>} : memref<19x8x384xf32, #tpu.memory_space<vmem>>, vector<1x8x384xf32>,
    %c17 = arith.constant 17 : index
    %109 = memref.load %arg1[%c17] : memref<51xf32, #tpu.memory_space<smem>>
    %110 = vector.broadcast %109 : f32 to vector<8x384xf32>
    %111 = arith.mulf %72, %110 : vector<8x384xf32>
    %c36 = arith.constant 36 : index
    %112 = memref.load %arg1[%c36] : memref<51xf32, #tpu.memory_space<smem>>
    %113 = vector.broadcast %112 : f32 to vector<8x384xf32>
    %114 = arith.addf %111, %113 : vector<8x384xf32>
    %c4_18 = arith.constant 4 : index
    %c0_19 = arith.constant 0 : index
    %c0_20 = arith.constant 0 : index
    %115 = vector.load %arg3[%c4_18, %c0_19, %c0_20] : memref<19x8x384xf32, #tpu.memory_space<vmem>>, vector<1x8x384xf32>
    %116 = vector.shape_cast %115 : vector<1x8x384xf32> to vector<8x384xf32>
    %117 = vector.shape_cast %114 : vector<8x384xf32> to vector<1x8x384xf32>
    tpu.vector_store %arg3[%c4_18, %c0_19, %c0_20], %117 {strides = array<i32>} : memref<19x8x384xf32, #tpu.memory_space<vmem>>, vector<1x8x384xf32>,
    %c18 = arith.constant 18 : index
    %118 = memref.load %arg1[%c18] : memref<51xf32, #tpu.memory_space<smem>>
    %119 = vector.broadcast %118 : f32 to vector<8x384xf32>
    %120 = arith.mulf %72, %119 : vector<8x384xf32>
    %c37 = arith.constant 37 : index
    %121 = memref.load %arg1[%c37] : memref<51xf32, #tpu.memory_space<smem>>
    %122 = vector.broadcast %121 : f32 to vector<8x384xf32>
    %123 = arith.addf %120, %122 : vector<8x384xf32>
    %c5_21 = arith.constant 5 : index
    %c0_22 = arith.constant 0 : index
    %c0_23 = arith.constant 0 : index
    %124 = vector.load %arg3[%c5_21, %c0_22, %c0_23] : memref<19x8x384xf32, #tpu.memory_space<vmem>>, vector<1x8x384xf32>
    %125 = vector.shape_cast %124 : vector<1x8x384xf32> to vector<8x384xf32>
    %126 = vector.shape_cast %123 : vector<8x384xf32> to vector<1x8x384xf32>
    tpu.vector_store %arg3[%c5_21, %c0_22, %c0_23], %126 {strides = array<i32>} : memref<19x8x384xf32, #tpu.memory_space<vmem>>, vector<1x8x384xf32>,
    %c19 = arith.constant 19 : index
    %127 = memref.load %arg1[%c19] : memref<51xf32, #tpu.memory_space<smem>>
    %128 = vector.broadcast %127 : f32 to vector<8x384xf32>
    %129 = arith.mulf %72, %128 : vector<8x384xf32>
    %c38 = arith.constant 38 : index
    %130 = memref.load %arg1[%c38] : memref<51xf32, #tpu.memory_space<smem>>
    %131 = vector.broadcast %130 : f32 to vector<8x384xf32>
    %132 = arith.addf %129, %131 : vector<8x384xf32>
    %c6_24 = arith.constant 6 : index
    %c0_25 = arith.constant 0 : index
    %c0_26 = arith.constant 0 : index
    %133 = vector.load %arg3[%c6_24, %c0_25, %c0_26] : memref<19x8x384xf32, #tpu.memory_space<vmem>>, vector<1x8x384xf32>
    %134 = vector.shape_cast %133 : vector<1x8x384xf32> to vector<8x384xf32>
    %135 = vector.shape_cast %132 : vector<8x384xf32> to vector<1x8x384xf32>
    tpu.vector_store %arg3[%c6_24, %c0_25, %c0_26], %135 {strides = array<i32>} : memref<19x8x384xf32, #tpu.memory_space<vmem>>, vector<1x8x384xf32>,
    %c20 = arith.constant 20 : index
    %136 = memref.load %arg1[%c20] : memref<51xf32, #tpu.memory_space<smem>>
    %137 = vector.broadcast %136 : f32 to vector<8x384xf32>
    %138 = arith.mulf %72, %137 : vector<8x384xf32>
    %c39 = arith.constant 39 : index
    %139 = memref.load %arg1[%c39] : memref<51xf32, #tpu.memory_space<smem>>
    %140 = vector.broadcast %139 : f32 to vector<8x384xf32>
    %141 = arith.addf %138, %140 : vector<8x384xf32>
    %c7_27 = arith.constant 7 : index
    %c0_28 = arith.constant 0 : index
    %c0_29 = arith.constant 0 : index
    %142 = vector.load %arg3[%c7_27, %c0_28, %c0_29] : memref<19x8x384xf32, #tpu.memory_space<vmem>>, vector<1x8x384xf32>
    %143 = vector.shape_cast %142 : vector<1x8x384xf32> to vector<8x384xf32>
    %144 = vector.shape_cast %141 : vector<8x384xf32> to vector<1x8x384xf32>
    tpu.vector_store %arg3[%c7_27, %c0_28, %c0_29], %144 {strides = array<i32>} : memref<19x8x384xf32, #tpu.memory_space<vmem>>, vector<1x8x384xf32>,
    %c21 = arith.constant 21 : index
    %145 = memref.load %arg1[%c21] : memref<51xf32, #tpu.memory_space<smem>>
    %146 = vector.broadcast %145 : f32 to vector<8x384xf32>
    %147 = arith.mulf %72, %146 : vector<8x384xf32>
    %c40 = arith.constant 40 : index
    %148 = memref.load %arg1[%c40] : memref<51xf32, #tpu.memory_space<smem>>
    %149 = vector.broadcast %148 : f32 to vector<8x384xf32>
    %150 = arith.addf %147, %149 : vector<8x384xf32>
    %c8_30 = arith.constant 8 : index
    %c0_31 = arith.constant 0 : index
    %c0_32 = arith.constant 0 : index
    %151 = vector.load %arg3[%c8_30, %c0_31, %c0_32] : memref<19x8x384xf32, #tpu.memory_space<vmem>>, vector<1x8x384xf32>
    %152 = vector.shape_cast %151 : vector<1x8x384xf32> to vector<8x384xf32>
    %153 = vector.shape_cast %150 : vector<8x384xf32> to vector<1x8x384xf32>
    tpu.vector_store %arg3[%c8_30, %c0_31, %c0_32], %153 {strides = array<i32>} : memref<19x8x384xf32, #tpu.memory_space<vmem>>, vector<1x8x384xf32>,
    %c22 = arith.constant 22 : index
    %154 = memref.load %arg1[%c22] : memref<51xf32, #tpu.memory_space<smem>>
    %155 = vector.broadcast %154 : f32 to vector<8x384xf32>
    %156 = arith.mulf %72, %155 : vector<8x384xf32>
    %c41 = arith.constant 41 : index
    %157 = memref.load %arg1[%c41] : memref<51xf32, #tpu.memory_space<smem>>
    %158 = vector.broadcast %157 : f32 to vector<8x384xf32>
    %159 = arith.addf %156, %158 : vector<8x384xf32>
    %c9_33 = arith.constant 9 : index
    %c0_34 = arith.constant 0 : index
    %c0_35 = arith.constant 0 : index
    %160 = vector.load %arg3[%c9_33, %c0_34, %c0_35] : memref<19x8x384xf32, #tpu.memory_space<vmem>>, vector<1x8x384xf32>
    %161 = vector.shape_cast %160 : vector<1x8x384xf32> to vector<8x384xf32>
    %162 = vector.shape_cast %159 : vector<8x384xf32> to vector<1x8x384xf32>
    tpu.vector_store %arg3[%c9_33, %c0_34, %c0_35], %162 {strides = array<i32>} : memref<19x8x384xf32, #tpu.memory_space<vmem>>, vector<1x8x384xf32>,
    %c23 = arith.constant 23 : index
    %163 = memref.load %arg1[%c23] : memref<51xf32, #tpu.memory_space<smem>>
    %164 = vector.broadcast %163 : f32 to vector<8x384xf32>
    %165 = arith.mulf %72, %164 : vector<8x384xf32>
    %c42 = arith.constant 42 : index
    %166 = memref.load %arg1[%c42] : memref<51xf32, #tpu.memory_space<smem>>
    %167 = vector.broadcast %166 : f32 to vector<8x384xf32>
    %168 = arith.addf %165, %167 : vector<8x384xf32>
    %c10_36 = arith.constant 10 : index
    %c0_37 = arith.constant 0 : index
    %c0_38 = arith.constant 0 : index
    %169 = vector.load %arg3[%c10_36, %c0_37, %c0_38] : memref<19x8x384xf32, #tpu.memory_space<vmem>>, vector<1x8x384xf32>
    %170 = vector.shape_cast %169 : vector<1x8x384xf32> to vector<8x384xf32>
    %171 = vector.shape_cast %168 : vector<8x384xf32> to vector<1x8x384xf32>
    tpu.vector_store %arg3[%c10_36, %c0_37, %c0_38], %171 {strides = array<i32>} : memref<19x8x384xf32, #tpu.memory_space<vmem>>, vector<1x8x384xf32>,
    %c24 = arith.constant 24 : index
    %172 = memref.load %arg1[%c24] : memref<51xf32, #tpu.memory_space<smem>>
    %173 = vector.broadcast %172 : f32 to vector<8x384xf32>
    %174 = arith.mulf %72, %173 : vector<8x384xf32>
    %c43 = arith.constant 43 : index
    %175 = memref.load %arg1[%c43] : memref<51xf32, #tpu.memory_space<smem>>
    %176 = vector.broadcast %175 : f32 to vector<8x384xf32>
    %177 = arith.addf %174, %176 : vector<8x384xf32>
    %c11_39 = arith.constant 11 : index
    %c0_40 = arith.constant 0 : index
    %c0_41 = arith.constant 0 : index
    %178 = vector.load %arg3[%c11_39, %c0_40, %c0_41] : memref<19x8x384xf32, #tpu.memory_space<vmem>>, vector<1x8x384xf32>
    %179 = vector.shape_cast %178 : vector<1x8x384xf32> to vector<8x384xf32>
    %180 = vector.shape_cast %177 : vector<8x384xf32> to vector<1x8x384xf32>
    tpu.vector_store %arg3[%c11_39, %c0_40, %c0_41], %180 {strides = array<i32>} : memref<19x8x384xf32, #tpu.memory_space<vmem>>, vector<1x8x384xf32>,
    %c25 = arith.constant 25 : index
    %181 = memref.load %arg1[%c25] : memref<51xf32, #tpu.memory_space<smem>>
    %182 = vector.broadcast %181 : f32 to vector<8x384xf32>
    %183 = arith.mulf %72, %182 : vector<8x384xf32>
    %c44 = arith.constant 44 : index
    %184 = memref.load %arg1[%c44] : memref<51xf32, #tpu.memory_space<smem>>
    %185 = vector.broadcast %184 : f32 to vector<8x384xf32>
    %186 = arith.addf %183, %185 : vector<8x384xf32>
    %c12_42 = arith.constant 12 : index
    %c0_43 = arith.constant 0 : index
    %c0_44 = arith.constant 0 : index
    %187 = vector.load %arg3[%c12_42, %c0_43, %c0_44] : memref<19x8x384xf32, #tpu.memory_space<vmem>>, vector<1x8x384xf32>
    %188 = vector.shape_cast %187 : vector<1x8x384xf32> to vector<8x384xf32>
    %189 = vector.shape_cast %186 : vector<8x384xf32> to vector<1x8x384xf32>
    tpu.vector_store %arg3[%c12_42, %c0_43, %c0_44], %189 {strides = array<i32>} : memref<19x8x384xf32, #tpu.memory_space<vmem>>, vector<1x8x384xf32>,
    %c26 = arith.constant 26 : index
    %190 = memref.load %arg1[%c26] : memref<51xf32, #tpu.memory_space<smem>>
    %191 = vector.broadcast %190 : f32 to vector<8x384xf32>
    %192 = arith.mulf %72, %191 : vector<8x384xf32>
    %c45 = arith.constant 45 : index
    %193 = memref.load %arg1[%c45] : memref<51xf32, #tpu.memory_space<smem>>
    %194 = vector.broadcast %193 : f32 to vector<8x384xf32>
    %195 = arith.addf %192, %194 : vector<8x384xf32>
    %c13_45 = arith.constant 13 : index
    %c0_46 = arith.constant 0 : index
    %c0_47 = arith.constant 0 : index
    %196 = vector.load %arg3[%c13_45, %c0_46, %c0_47] : memref<19x8x384xf32, #tpu.memory_space<vmem>>, vector<1x8x384xf32>
    %197 = vector.shape_cast %196 : vector<1x8x384xf32> to vector<8x384xf32>
    %198 = vector.shape_cast %195 : vector<8x384xf32> to vector<1x8x384xf32>
    tpu.vector_store %arg3[%c13_45, %c0_46, %c0_47], %198 {strides = array<i32>} : memref<19x8x384xf32, #tpu.memory_space<vmem>>, vector<1x8x384xf32>,
    %c27 = arith.constant 27 : index
    %199 = memref.load %arg1[%c27] : memref<51xf32, #tpu.memory_space<smem>>
    %200 = vector.broadcast %199 : f32 to vector<8x384xf32>
    %201 = arith.mulf %72, %200 : vector<8x384xf32>
    %c46 = arith.constant 46 : index
    %202 = memref.load %arg1[%c46] : memref<51xf32, #tpu.memory_space<smem>>
    %203 = vector.broadcast %202 : f32 to vector<8x384xf32>
    %204 = arith.addf %201, %203 : vector<8x384xf32>
    %c14_48 = arith.constant 14 : index
    %c0_49 = arith.constant 0 : index
    %c0_50 = arith.constant 0 : index
    %205 = vector.load %arg3[%c14_48, %c0_49, %c0_50] : memref<19x8x384xf32, #tpu.memory_space<vmem>>, vector<1x8x384xf32>
    %206 = vector.shape_cast %205 : vector<1x8x384xf32> to vector<8x384xf32>
    %207 = vector.shape_cast %204 : vector<8x384xf32> to vector<1x8x384xf32>
    tpu.vector_store %arg3[%c14_48, %c0_49, %c0_50], %207 {strides = array<i32>} : memref<19x8x384xf32, #tpu.memory_space<vmem>>, vector<1x8x384xf32>,
    %c28 = arith.constant 28 : index
    %208 = memref.load %arg1[%c28] : memref<51xf32, #tpu.memory_space<smem>>
    %209 = vector.broadcast %208 : f32 to vector<8x384xf32>
    %210 = arith.mulf %72, %209 : vector<8x384xf32>
    %c47 = arith.constant 47 : index
    %211 = memref.load %arg1[%c47] : memref<51xf32, #tpu.memory_space<smem>>
    %212 = vector.broadcast %211 : f32 to vector<8x384xf32>
    %213 = arith.addf %210, %212 : vector<8x384xf32>
    %c15_51 = arith.constant 15 : index
    %c0_52 = arith.constant 0 : index
    %c0_53 = arith.constant 0 : index
    %214 = vector.load %arg3[%c15_51, %c0_52, %c0_53] : memref<19x8x384xf32, #tpu.memory_space<vmem>>, vector<1x8x384xf32>
    %215 = vector.shape_cast %214 : vector<1x8x384xf32> to vector<8x384xf32>
    %216 = vector.shape_cast %213 : vector<8x384xf32> to vector<1x8x384xf32>
    tpu.vector_store %arg3[%c15_51, %c0_52, %c0_53], %216 {strides = array<i32>} : memref<19x8x384xf32, #tpu.memory_space<vmem>>, vector<1x8x384xf32>,
    %c29 = arith.constant 29 : index
    %217 = memref.load %arg1[%c29] : memref<51xf32, #tpu.memory_space<smem>>
    %218 = vector.broadcast %217 : f32 to vector<8x384xf32>
    %219 = arith.mulf %72, %218 : vector<8x384xf32>
    %c48 = arith.constant 48 : index
    %220 = memref.load %arg1[%c48] : memref<51xf32, #tpu.memory_space<smem>>
    %221 = vector.broadcast %220 : f32 to vector<8x384xf32>
    %222 = arith.addf %219, %221 : vector<8x384xf32>
    %c16_54 = arith.constant 16 : index
    %c0_55 = arith.constant 0 : index
    %c0_56 = arith.constant 0 : index
    %223 = vector.load %arg3[%c16_54, %c0_55, %c0_56] : memref<19x8x384xf32, #tpu.memory_space<vmem>>, vector<1x8x384xf32>
    %224 = vector.shape_cast %223 : vector<1x8x384xf32> to vector<8x384xf32>
    %225 = vector.shape_cast %222 : vector<8x384xf32> to vector<1x8x384xf32>
    tpu.vector_store %arg3[%c16_54, %c0_55, %c0_56], %225 {strides = array<i32>} : memref<19x8x384xf32, #tpu.memory_space<vmem>>, vector<1x8x384xf32>,
    %c30 = arith.constant 30 : index
    %226 = memref.load %arg1[%c30] : memref<51xf32, #tpu.memory_space<smem>>
    %227 = vector.broadcast %226 : f32 to vector<8x384xf32>
    %228 = arith.mulf %72, %227 : vector<8x384xf32>
    %c49 = arith.constant 49 : index
    %229 = memref.load %arg1[%c49] : memref<51xf32, #tpu.memory_space<smem>>
    %230 = vector.broadcast %229 : f32 to vector<8x384xf32>
    %231 = arith.addf %228, %230 : vector<8x384xf32>
    %c17_57 = arith.constant 17 : index
    %c0_58 = arith.constant 0 : index
    %c0_59 = arith.constant 0 : index
    %232 = vector.load %arg3[%c17_57, %c0_58, %c0_59] : memref<19x8x384xf32, #tpu.memory_space<vmem>>, vector<1x8x384xf32>
    %233 = vector.shape_cast %232 : vector<1x8x384xf32> to vector<8x384xf32>
    %234 = vector.shape_cast %231 : vector<8x384xf32> to vector<1x8x384xf32>
    tpu.vector_store %arg3[%c17_57, %c0_58, %c0_59], %234 {strides = array<i32>} : memref<19x8x384xf32, #tpu.memory_space<vmem>>, vector<1x8x384xf32>,
    %c31 = arith.constant 31 : index
    %235 = memref.load %arg1[%c31] : memref<51xf32, #tpu.memory_space<smem>>
    %236 = vector.broadcast %235 : f32 to vector<8x384xf32>
    %237 = arith.mulf %72, %236 : vector<8x384xf32>
    %c50 = arith.constant 50 : index
    %238 = memref.load %arg1[%c50] : memref<51xf32, #tpu.memory_space<smem>>
    %239 = vector.broadcast %238 : f32 to vector<8x384xf32>
    %240 = arith.addf %237, %239 : vector<8x384xf32>
    %c18_60 = arith.constant 18 : index
    %c0_61 = arith.constant 0 : index
    %c0_62 = arith.constant 0 : index
    %241 = vector.load %arg3[%c18_60, %c0_61, %c0_62] : memref<19x8x384xf32, #tpu.memory_space<vmem>>, vector<1x8x384xf32>
    %242 = vector.shape_cast %241 : vector<1x8x384xf32> to vector<8x384xf32>
    %243 = vector.shape_cast %240 : vector<8x384xf32> to vector<1x8x384xf32>
    tpu.vector_store %arg3[%c18_60, %c0_61, %c0_62], %243 {strides = array<i32>} : memref<19x8x384xf32, #tpu.memory_space<vmem>>, vector<1x8x384xf32>,
    return
  }
  func.func @transform_0(%arg0: i32) -> i32 {
    %c0_i32 = arith.constant 0 : i32
    %c0_i32_0 = arith.constant 0 : i32
    return %c0_i32 : i32
  }
  func.func @transform_1(%arg0: i32) -> (i32, i32) {
    %c0_i32 = arith.constant 0 : i32
    %c0_i32_0 = arith.constant 0 : i32
    return %c0_i32, %arg0 : i32, i32
  }
  func.func @transform_2(%arg0: i32) -> (i32, i32, i32) {
    %c0_i32 = arith.constant 0 : i32
    %c0_i32_0 = arith.constant 0 : i32
    %c0_i32_1 = arith.constant 0 : i32
    return %c0_i32, %c0_i32_0, %arg0 : i32, i32, i32
  }
}

</mosaic_0001>

<bundles_post_ra>
// kernel: tpu_custom_call.1
= control target key start
LH: loop header
LB: loop body
LE: loop exit
PB: predicated region body
PF: predicated region fallthrough
CT: control target
= control target key end

     0   :  { %s1125_s0 = inlined_call_operand.hbm [shape: f32[51], index: 0, kind: input, shape index: {}]   ;;  %s1126_s1 = inlined_call_operand.hbm [shape: f32[8,384], index: 1, kind: input, shape index: {}]   ;;  %s1127_s2 = inlined_call_operand.hbm [shape: f32[19,8,384], index: 2, kind: output, shape index: {}]  }
   0x1   :  { %1129 = sst [smem:[#allocation15_spill]] %s1127_s2 }
   0x2   :  { %7 = vsyncpa [#allocation5], 0 }
   0x3   :  { %8 = vsyncpa [#allocation3], 0 }
   0x4   :  { %9 = vsyncpa [#allocation4], 0  ;;  %s630_s11 = scalar_lea.hbm %s1125_s0, 16 }
   0x5   :  { %p631_p0 = scmp.ne.s32.totalorder %s1125_s0, %s630_s11  ;;  %p634_p1 = scmp.lt.u32.totalorder %s630_s11, %s1125_s0 }
   0x7   :  { %p636_p2 = pnand %p634_p1, %p631_p0 }
   0x9   :  { %639 = shalt.err (!%p636_p2)
}
   0xa   :  { %s690_s16 = smov [#allocation2]   ;;  %s691_s19 = smov [#allocation6]  }
   0xb   :  { %17 = dma.hbm_to_smem %s1125_s0, 16, %s690_s16, [#allocation5]  }
   0xc   :  { %s24_s20 = sshll.u32 %s691_s19, 4  ;;  %s640_s23 = scalar_lea.hbm %s1126_s1, 384  ;;  %s25_s20 = int_to_ptr.vmem [resolvable:$true] %s24_s20 }
   0xd   :  { %p641_p3 = scmp.ne.s32.totalorder %s1126_s1, %s640_s23  ;;  %p644_p4 = scmp.lt.u32.totalorder %s640_s23, %s1126_s1 }
   0xf   :  { %p646_p5 = pnand %p644_p4, %p641_p3 }
  0x11   :  { %649 = shalt.err (!%p646_p5)
}
  0x12   :  { %s650_s28 = scalar_lea.vmem %s25_s20, 384  ;;  %p655_p7 = scmp.lt.s32.totalorder %s25_s20, %s25_s20 }
  0x13   :  { %p651_p6 = scmp.ne.s32.totalorder %s25_s20, %s650_s28  ;;  %p656_p8 = scmp.lt.s32.totalorder %s650_s28, %s650_s28 }
  0x15   :  { %p657_p9 = por %p656_p8, %p655_p7 }
  0x17   :  { %p658_p10 = pnand %p657_p9, %p651_p6 }
  0x19   :  { %661 = shalt.err (!%p658_p10)
}
  0x1a   :  { %27 = dma.hbm_to_vmem [thread:$0]  %s1126_s1, 384, %s25_s20, [#allocation3]  }
  0x1b   :  { %684 = dma.done.wait [#allocation5], 16  }
  0x1c   :  { %685 = vsyncadd [#allocation5], 4294967280 }
  0x1d   :  { %686 = dma.done.wait [#allocation3], 384  }
  0x1e   :  { %687 = vsyncadd [#allocation3], 4294966912 }
  0x1f   :  { %34 = sfence }
  0x20   :  { %s38_s30 = sld [smem:[#allocation2]]  ;;  %s500_s3 = sld [smem:[#allocation2 + $0x2]]  ;;  %v35_v0 = vld [vmem:[#allocation6] sm:$0xff]  ;;  %v36_v1 = vld [vmem:[#allocation6 + $0x8] sm:$0xff]  ;;  %v37_v14 = vld [vmem:[#allocation6 + $0x10] sm:$0xff] }
  0x21   :  { %s504_s4 = sld [smem:[#allocation2 + $0x1]]  ;;  %s505_s5 = sld [smem:[#allocation2 + $0x3]] }
  0x22   :  { %s509_s1 = sld [smem:[#allocation2 + $0x4]]  ;;  %s515_s6 = sld [smem:[#allocation2 + $0x5]] }
  0x23   :  { %s510_s7 = sld [smem:[#allocation2 + $0x6]]  ;;  %s516_s8 = sld [smem:[#allocation2 + $0x7]] }
  0x24   :  { %s511_s9 = sld [smem:[#allocation2 + $0x8]]  ;;  %s517_s10 = sld [smem:[#allocation2 + $0x9]] }
  0x25   :  { %s521_s11 = sld [smem:[#allocation2 + $0xa]]  ;;  %s522_s12 = sld [smem:[#allocation2 + $0xb]] }
  0x26   :  { %v39_v2 = vstv %s38_s30  ;;  %v44_v3 = vstv %s500_s3  ;;  %s523_s13 = sld [smem:[#allocation2 + $0xc]]  ;;  %s739_s14 = sld [smem:[#allocation2 + $0xd]] }
  0x27   :  { %v40_v4 = vmul.f32 %v39_v2, %v35_v0  ;;  %v70_v5 = vstv %s504_s4  ;;  %v75_v6 = vstv %s505_s5  ;;  %v41_v7 = vmul.f32 %v39_v2, %v36_v1  ;;  %s741_s15 = sld [smem:[#allocation2 + $0x20]]  ;;  %s744_s16 = sld [smem:[#allocation2 + $0xe]] }
  0x28   :  { %v71_v8 = vmul.f32 %v70_v5, %v35_v0  ;;  %v72_v9 = vmul.f32 %v70_v5, %v36_v1  ;;  %v42_v19 = vmul.f32 %v39_v2, %v37_v14  ;;  %v73_v20 = vmul.f32 %v70_v5, %v37_v14  ;;  %s746_s17 = sld [smem:[#allocation2 + $0x21]]  ;;  %s748_s18 = sld [smem:[#allocation2 + $0xf]] }
  0x29   :  { %v45_v10 = vadd.f32 %v44_v3, %v40_v4  ;;  %v46_v11 = vadd.f32 %v44_v3, %v41_v7  ;;  %v101_v38 = vstv %s509_s1  ;;  %v140_v39 = vstv %s515_s6  ;;  %s750_s19 = sld [smem:[#allocation2 + $0x22]]  ;;  %s752_s20 = sld [smem:[#allocation2 + $0x10]] }
  0x2a   :  { %v76_v12 = vadd.f32 %v75_v6, %v71_v8  ;;  %v77_v13 = vadd.f32 %v75_v6, %v72_v9  ;;  %v47_v21 = vadd.f32 %v44_v3, %v42_v19  ;;  %v78_v22 = vadd.f32 %v75_v6, %v73_v20  ;;  %s754_s21 = sld [smem:[#allocation2 + $0x23]]  ;;  %s758_s22 = sld [smem:[#allocation2 + $0x11]] }
  0x2b   :  { %v501_v15 = vmul.f32 -1.442695, %v45_v10  ;;  %v502_v16 = vmul.f32 -1.442695, %v46_v11  ;;  %v106_v42 = vstv %s510_s7  ;;  %v145_v43 = vstv %s516_s8  ;;  %s760_s23 = sld [smem:[#allocation2 + $0x24]]  ;;  %s762_s24 = sld [smem:[#allocation2 + $0x12]] }
  0x2c   :  { %v506_v17 = vmul.f32 -1.442695, %v76_v12  ;;  %v507_v18 = vmul.f32 -1.442695, %v77_v13  ;;  %v503_v23 = vmul.f32 -1.442695, %v47_v21  ;;  %v114_v53 = vstv %s511_s9 }
  0x2d   :  { %570 = vpow2.f32 %v501_v15  ;;  %v508_v24 = vmul.f32 -1.442695, %v78_v22  ;;  %v153_v54 = vstv %s517_s10  ;;  %s764_s25 = sld [smem:[#allocation2 + $0x25]]  ;;  %s767_s26 = sld [smem:[#allocation2 + $0x13]] }
  0x2e   :  { %572 = vpow2.f32 %v506_v17  ;;  %s769_s27 = sld [smem:[#allocation2 + $0x26]]  ;;  %s771_s28 = sld [smem:[#allocation2 + $0x14]] }
  0x2f   :  { %574 = vpow2.f32 %v502_v16  ;;  %s773_s0 = sld [smem:[#allocation2 + $0x27]]  ;;  %s775_s29 = sld [smem:[#allocation2 + $0x15]] }
  0x30   :  { %576 = vpow2.f32 %v507_v18  ;;  %s777_s30 = sld [smem:[#allocation2 + $0x28]]  ;;  %s779_s3 = sld [smem:[#allocation2 + $0x16]] }
  0x31   :  { %578 = vpow2.f32 %v503_v23  ;;  %s781_s4 = sld [smem:[#allocation2 + $0x29]]  ;;  %s783_s5 = sld [smem:[#allocation2 + $0x17]] }
  0x32   :  { %580 = vpow2.f32 %v508_v24  ;;  %s785_s1 = sld [smem:[#allocation2 + $0x2a]]  ;;  %s787_s6 = sld [smem:[#allocation2 + $0x18]] }
  0x33   :  { %s789_s7 = sld [smem:[#allocation2 + $0x2b]]  ;;  %s791_s8 = sld [smem:[#allocation2 + $0x19]] }
  0x34   :  { %s793_s9 = sld [smem:[#allocation2 + $0x2c]]  ;;  %s795_s10 = sld [smem:[#allocation2 + $0x1a]] }
  0x35   :  { %s803_s2 = sld [smem:[#allocation2 + $0x1c]] }
  0x37   :  { %v571_v25 = vpop.eup %570 }
  0x38   :  { %v573_v26 = vpop.eup %572  ;;  %v57_v27 = vadd.f32 1.0, %v571_v25 }
  0x39   :  { %v575_v28 = vpop.eup %574  ;;  %v88_v29 = vadd.f32 1.0, %v573_v26 }
  0x3a   :  { %v577_v30 = vpop.eup %576  ;;  %582 = vrcp.f32 %v57_v27  ;;  %v58_v31 = vadd.f32 1.0, %v575_v28  ;;  %1130 = sst [smem:[#allocation11_spill]] %s793_s9  ;;  %s805_s9 = sld [smem:[#allocation2 + $0x2f]] }
  0x3b   :  { %584 = vrcp.f32 %v88_v29  ;;  %v89_v32 = vadd.f32 1.0, %v577_v30  ;;  %v579_v33 = vpop.eup %578  ;;  %1131 = sst [smem:[#allocation12_spill]] %s795_s10  ;;  %s810_s10 = sld [smem:[#allocation2 + $0x1d]] }
  0x3c   :  { %586 = vrcp.f32 %v58_v31  ;;  %v581_v34 = vpop.eup %580  ;;  %v59_v35 = vadd.f32 1.0, %v579_v33 }
  0x3d   :  { %588 = vrcp.f32 %v89_v32  ;;  %v90_v36 = vadd.f32 1.0, %v581_v34  ;;  %v179_v34 = vstv %s521_s11  ;;  %s797_s11 = sld [smem:[#allocation2 + $0x2d]] }
  0x3e   :  { %590 = vrcp.f32 %v59_v35 }
  0x3f   :  { %592 = vrcp.f32 %v90_v36 }
  0x41   :  { %1133 = sst [smem:[#allocation14_spill]] %s810_s10  ;;  %s828_s10 = sld [smem:[#allocation2 + $0x31]] }
  0x43   :  { %1132 = sst [smem:[#allocation13_spill]] %s797_s11  ;;  %s812_s11 = sld [smem:[#allocation2 + $0x30]] }
  0x44   :  { %v583_v37 = vpop.eup %582 }
  0x45   :  { %v585_v40 = vpop.eup %584  ;;  %v66_v41 = vmul.f32 %v583_v37, %v45_v10  ;;  %v184_v37 = vstv %s522_s12  ;;  %s799_s12 = sld [smem:[#allocation2 + $0x1b]] }
  0x46   :  { %v587_v44 = vpop.eup %586  ;;  %v97_v45 = vmul.f32 %v585_v40, %v76_v12 }
  0x47   :  { %v589_v46 = vpop.eup %588  ;;  %v102_v47 = vmul.f32 %v101_v38, %v66_v41  ;;  %v141_v48 = vmul.f32 %v140_v39, %v66_v41  ;;  %v67_v49 = vmul.f32 %v587_v44, %v46_v11 }
  0x48   :  { %v107_v50 = vmul.f32 %v106_v42, %v97_v45  ;;  %v146_v51 = vmul.f32 %v145_v43, %v97_v45  ;;  %v98_v52 = vmul.f32 %v589_v46, %v77_v13  ;;  %v591_v57 = vpop.eup %590  ;;  %v192_v45 = vstv %s523_s13  ;;  %s801_s13 = sld [smem:[#allocation2 + $0x2e]] }
  0x49   :  { %v103_v55 = vmul.f32 %v101_v38, %v67_v49  ;;  %v142_v56 = vmul.f32 %v140_v39, %v67_v49  ;;  %v593_v62 = vpop.eup %592  ;;  %v68_v63 = vmul.f32 %v591_v57, %v47_v21 }
  0x4a   :  { %v110_v58 = vadd.f32 %v107_v50, %v102_v47  ;;  %v149_v59 = vadd.f32 %v146_v51, %v141_v48  ;;  %v108_v60 = vmul.f32 %v106_v42, %v98_v52  ;;  %v147_v61 = vmul.f32 %v145_v43, %v98_v52 }
  0x4b   :  { %v99_v4 = vmul.f32 %v593_v62, %v78_v22  ;;  %v104_v5 = vmul.f32 %v101_v38, %v68_v63  ;;  %v143_v6 = vmul.f32 %v140_v39, %v68_v63 }
  0x4c   :  { %v115_v0 = vadd.f32 %v114_v53, %v110_v58  ;;  %v154_v1 = vadd.f32 %v153_v54, %v149_v59  ;;  %v111_v2 = vadd.f32 %v108_v60, %v103_v55  ;;  %v150_v3 = vadd.f32 %v147_v61, %v142_v56 }
  0x4d   :  { %v109_v11 = vmul.f32 %v106_v42, %v99_v4  ;;  %v148_v12 = vmul.f32 %v145_v43, %v99_v4  ;;  %v815_v4 = vstv %s741_s15  ;;  %s842_s15 = sld [smem:[#allocation2 + $0x1f]] }
  0x4e   :  { %v512_v7 = vmul.f32 -1.442695, %v115_v0  ;;  %v518_v8 = vmul.f32 -1.442695, %v154_v1  ;;  %v116_v9 = vadd.f32 %v114_v53, %v111_v2  ;;  %v155_v10 = vadd.f32 %v153_v54, %v150_v3 }
  0x4f   :  { %v112_v15 = vadd.f32 %v109_v11, %v104_v5  ;;  %v151_v16 = vadd.f32 %v148_v12, %v143_v6  ;;  %v808_v3 = vstv %s739_s14  ;;  %v818_v5 = vstv %s744_s16  ;;  %s826_s14 = sld [smem:[#allocation2 + $0x1e]]  ;;  %s844_s16 = sld [smem:[#allocation2 + $0x32]] }
  0x50   :  { %594 = vpow2.f32 %v512_v7  ;;  %v513_v13 = vmul.f32 -1.442695, %v116_v9  ;;  %v519_v14 = vmul.f32 -1.442695, %v155_v10  ;;  %v821_v6 = vstv %s746_s17  ;;  %s1134_s17 = sld [smem:[#allocation11_spill]] }
  0x51   :  { %596 = vpow2.f32 %v518_v8  ;;  %v117_v17 = vadd.f32 %v114_v53, %v112_v15  ;;  %v156_v18 = vadd.f32 %v153_v54, %v151_v16  ;;  %v824_v7 = vstv %s748_s18  ;;  %s1135_s18 = sld [smem:[#allocation12_spill]] }
  0x52   :  { %598 = vpow2.f32 %v513_v13  ;;  %v837_v11 = vstv %s754_s21  ;;  %v840_v12 = vstv %s758_s22  ;;  %v850_v15 = vstv %s762_s24 }
  0x53   :  { %600 = vpow2.f32 %v519_v14  ;;  %v514_v19 = vmul.f32 -1.442695, %v117_v17  ;;  %v520_v20 = vmul.f32 -1.442695, %v156_v18  ;;  %v847_v14 = vstv %s760_s23 }
  0x54   :  { %v853_v16 = vstv %s764_s25 }
  0x55   :  { %602 = vpow2.f32 %v514_v19  ;;  %v862_v19 = vstv %s771_s28 }
  0x56   :  { %604 = vpow2.f32 %v520_v20  ;;  %v865_v20 = vstv %s773_s0 }
  0x5a   :  { %v595_v21 = vpop.eup %594 }
  0x5b   :  { %v597_v22 = vpop.eup %596  ;;  %v127_v23 = vadd.f32 1.0, %v595_v21  ;;  %v868_v21 = vstv %s775_s29 }
  0x5c   :  { %v599_v24 = vpop.eup %598  ;;  %v166_v25 = vadd.f32 1.0, %v597_v22  ;;  %v871_v22 = vstv %s777_s30 }
  0x5d   :  { %v601_v26 = vpop.eup %600  ;;  %606 = vrcp.f32 %v127_v23  ;;  %v128_v27 = vadd.f32 1.0, %v599_v24  ;;  %v874_v23 = vstv %s779_s3  ;;  %v877_v24 = vstv %s781_s4 }
  0x5e   :  { %608 = vrcp.f32 %v166_v25  ;;  %v167_v28 = vadd.f32 1.0, %v601_v26  ;;  %v880_v25 = vstv %s783_s5  ;;  %v883_v26 = vstv %s785_s1 }
  0x5f   :  { %610 = vrcp.f32 %v128_v27  ;;  %v603_v29 = vpop.eup %602  ;;  %v886_v27 = vstv %s787_s6 }
  0x60   :  { %612 = vrcp.f32 %v167_v28  ;;  %v605_v30 = vpop.eup %604  ;;  %v129_v31 = vadd.f32 1.0, %v603_v29  ;;  %v889_v28 = vstv %s789_s7  ;;  %v892_v29 = vstv %s791_s8 }
  0x61   :  { %v168_v32 = vadd.f32 1.0, %v605_v30  ;;  %v895_v30 = vstv %s1134_s17 }
  0x62   :  { %614 = vrcp.f32 %v129_v31  ;;  %v898_v31 = vstv %s1135_s18 }
  0x63   :  { %616 = vrcp.f32 %v168_v32 }
  0x67   :  { %v607_v33 = vpop.eup %606 }
  0x68   :  { %v609_v35 = vpop.eup %608  ;;  %v136_v36 = vmul.f32 %v607_v33, %v115_v0 }
  0x69   :  { %v611_v38 = vpop.eup %610  ;;  %v175_v39 = vmul.f32 %v609_v35, %v154_v1  ;;  %v907_v35 = vstv %s801_s13 }
  0x6a   :  { %v613_v40 = vpop.eup %612  ;;  %v180_v41 = vmul.f32 %v179_v34, %v136_v36  ;;  %v137_v42 = vmul.f32 %v611_v38, %v116_v9  ;;  %v831_v9 = vstv %s750_s19  ;;  %s1136_s19 = sld [smem:[#allocation13_spill]]  ;;  %v910_v36 = vstv %s803_s2  ;;  %s692_s2 = smov [#allocation7]  }
  0x6b   :  { %v185_v43 = vmul.f32 %v184_v37, %v175_v39  ;;  %v176_v44 = vmul.f32 %v613_v40, %v155_v10  ;;  %v834_v10 = vstv %s752_s20  ;;  %s1137_s20 = sld [smem:[#allocation14_spill]]  ;;  %v916_v38 = vstv %s805_s9  ;;  %s487_s21 = sshll.u32 %s692_s2, 4  ;;  %s488_s21 = int_to_ptr.vmem [resolvable:$true] %s487_s21 }
  0x6c   :  { %v181_v46 = vmul.f32 %v179_v34, %v137_v42  ;;  %v615_v49 = vpop.eup %614  ;;  %v922_v40 = vstv %s812_s11  ;;  %v925_v42 = vstv %s826_s14  ;;  %s662_s22 = scalar_lea.vmem %s488_s21, 7296  ;;  %p667_p12 = scmp.lt.s32.totalorder %s488_s21, %s488_s21 }
  0x6d   :  { %v188_v47 = vadd.f32 %v185_v43, %v180_v41  ;;  %v186_v48 = vmul.f32 %v184_v37, %v176_v44  ;;  %v617_v50 = vpop.eup %616  ;;  %v138_v53 = vmul.f32 %v615_v49, %v117_v17  ;;  %v856_v17 = vstv %s767_s26  ;;  %p663_p11 = scmp.ne.s32.totalorder %s488_s21, %s662_s22  ;;  %p668_p13 = scmp.lt.s32.totalorder %s662_s22, %s662_s22 }
  0x6e   :  { %v177_v54 = vmul.f32 %v617_v50, %v156_v18  ;;  %v859_v18 = vstv %s769_s27  ;;  %v928_v43 = vstv %s828_s10  ;;  %v931_v44 = vstv %s842_s15 }
  0x6f   :  { %v734_v51 = vadd.f32 %v192_v45, %v188_v47  ;;  %v189_v52 = vadd.f32 %v186_v48, %v181_v46  ;;  %v182_v57 = vmul.f32 %v179_v34, %v138_v53  ;;  %v904_v34 = vstv %s799_s12  ;;  %p669_p0 = por %p668_p13, %p667_p12 }
  0x70   :  { %v187_v58 = vmul.f32 %v184_v37, %v177_v54  ;;  %v901_v33 = vstv %s1136_s19 }
  0x71   :  { %v524_v55 = vmul.f32 -1.442695, %v734_v51  ;;  %v737_v56 = vadd.f32 %v192_v45, %v189_v52  ;;  %v919_v39 = vstv %s1137_s20  ;;  %p670_p1 = pnand %p669_p0, %p663_p11 }
  0x72   :  { %v190_v60 = vadd.f32 %v187_v58, %v182_v57 }
  0x73   :  { %618 = vpow2.f32 %v524_v55  ;;  %v525_v59 = vmul.f32 -1.442695, %v737_v56 }
  0x74   :  { %v756_v61 = vadd.f32 %v192_v45, %v190_v60  ;;  %v934_v45 = vstv %s844_s16 }
  0x75   :  { %620 = vpow2.f32 %v525_v59 }
  0x76   :  { %v526_v62 = vmul.f32 -1.442695, %v756_v61 }
  0x78   :  { %622 = vpow2.f32 %v526_v62 }
  0x7d   :  { %v619_v63 = vpop.eup %618 }
  0x7e   :  { %v205_v0 = vadd.f32 1.0, %v619_v63 }
  0x7f   :  { %v621_v1 = vpop.eup %620 }
  0x80   :  { %624 = vrcp.f32 %v205_v0  ;;  %v206_v2 = vadd.f32 1.0, %v621_v1 }
  0x82   :  { %626 = vrcp.f32 %v206_v2  ;;  %v623_v8 = vpop.eup %622 }
  0x83   :  { %v207_v13 = vadd.f32 1.0, %v623_v8 }
  0x85   :  { %628 = vrcp.f32 %v207_v13 }
  0x8a   :  { %v625_v32 = vpop.eup %624 }
  0x8b   :  { %v913_v37 = vmul.f32 %v625_v32, %v734_v51 }
  0x8c   :  { %v627_v41 = vpop.eup %626 }
  0x8d   :  { %v219_v46 = vmul.f32 %v808_v3, %v913_v37  ;;  %v939_v47 = vmul.f32 %v627_v41, %v737_v56  ;;  %v232_v48 = vmul.f32 %v818_v5, %v913_v37  ;;  %v246_v49 = vmul.f32 %v824_v7, %v913_v37 }
  0x8e   :  { %v260_v50 = vmul.f32 %v834_v10, %v913_v37  ;;  %v274_v51 = vmul.f32 %v840_v12, %v913_v37  ;;  %v288_v52 = vmul.f32 %v850_v15, %v913_v37  ;;  %v302_v53 = vmul.f32 %v856_v17, %v913_v37 }
  0x8f   :  { %v224_v54 = vadd.f32 %v815_v4, %v219_v46  ;;  %v220_v55 = vmul.f32 %v808_v3, %v939_v47  ;;  %v237_v56 = vadd.f32 %v821_v6, %v232_v48  ;;  %v233_v57 = vmul.f32 %v818_v5, %v939_v47  ;;  %v629_v63 = vpop.eup %628 }
  0x90   :  { %v251_v58 = vadd.f32 %v831_v9, %v246_v49  ;;  %v247_v59 = vmul.f32 %v824_v7, %v939_v47  ;;  %v265_v60 = vadd.f32 %v837_v11, %v260_v50  ;;  %v261_v62 = vmul.f32 %v834_v10, %v939_v47 }
  0x91   :  { %227 = vst [vmem:[#allocation7] sm:$0xff] %v224_v54  ;;  %v225_v0 = vadd.f32 %v815_v4, %v220_v55  ;;  %241 = vst [vmem:[#allocation7 + $0x18] sm:$0xff] %v237_v56  ;;  %v238_v1 = vadd.f32 %v821_v6, %v233_v57  ;;  %v279_v2 = vadd.f32 %v847_v14, %v274_v51 }
  0x92   :  { %v275_v8 = vmul.f32 %v840_v12, %v939_v47  ;;  %v971_v13 = vmul.f32 %v629_v63, %v756_v61  ;;  %255 = vst [vmem:[#allocation7 + $0x30] sm:$0xff] %v251_v58  ;;  %v252_v32 = vadd.f32 %v831_v9, %v247_v59  ;;  %269 = vst [vmem:[#allocation7 + $0x48] sm:$0xff] %v265_v60 }
  0x93   :  { %v266_v41 = vadd.f32 %v837_v11, %v261_v62  ;;  %v293_v46 = vadd.f32 %v853_v16, %v288_v52  ;;  %228 = vst [vmem:[#allocation7 + $0x8] sm:$0xff] %v225_v0  ;;  %242 = vst [vmem:[#allocation7 + $0x20] sm:$0xff] %v238_v1  ;;  %v289_v49 = vmul.f32 %v850_v15, %v939_v47 }
  0x94   :  { %283 = vst [vmem:[#allocation7 + $0x60] sm:$0xff] %v279_v2  ;;  %v280_v48 = vadd.f32 %v847_v14, %v275_v8  ;;  %v307_v50 = vadd.f32 %v859_v18, %v302_v53  ;;  %v303_v61 = vmul.f32 %v856_v17, %v939_v47  ;;  %v221_v51 = vmul.f32 %v808_v3, %v971_v13 }
  0x95   :  { %v234_v54 = vmul.f32 %v818_v5, %v971_v13  ;;  %256 = vst [vmem:[#allocation7 + $0x38] sm:$0xff] %v252_v32  ;;  %v248_v52 = vmul.f32 %v824_v7, %v971_v13  ;;  %270 = vst [vmem:[#allocation7 + $0x50] sm:$0xff] %v266_v41  ;;  %v262_v55 = vmul.f32 %v834_v10, %v971_v13 }
  0x96   :  { %297 = vst [vmem:[#allocation7 + $0x78] sm:$0xff] %v293_v46  ;;  %284 = vst [vmem:[#allocation7 + $0x68] sm:$0xff] %v280_v48  ;;  %v276_v53 = vmul.f32 %v840_v12, %v971_v13  ;;  %v294_v56 = vadd.f32 %v853_v16, %v289_v49  ;;  %v290_v3 = vmul.f32 %v850_v15, %v971_v13 }
  0x97   :  { %311 = vst [vmem:[#allocation7 + $0x90] sm:$0xff] %v307_v50  ;;  %v308_v5 = vadd.f32 %v859_v18, %v303_v61  ;;  %v226_v57 = vadd.f32 %v815_v4, %v221_v51  ;;  %v239_v7 = vadd.f32 %v821_v6, %v234_v54  ;;  %v253_v58 = vadd.f32 %v831_v9, %v248_v52 }
  0x98   :  { %v267_v10 = vadd.f32 %v837_v11, %v262_v55  ;;  %v281_v59 = vadd.f32 %v847_v14, %v276_v53  ;;  %298 = vst [vmem:[#allocation7 + $0x80] sm:$0xff] %v294_v56  ;;  %v295_v12 = vadd.f32 %v853_v16, %v290_v3  ;;  %v304_v15 = vmul.f32 %v856_v17, %v971_v13 }
  0x99   :  { %312 = vst [vmem:[#allocation7 + $0x98] sm:$0xff] %v308_v5  ;;  %v316_v60 = vmul.f32 %v862_v19, %v913_v37  ;;  %229 = vst [vmem:[#allocation7 + $0x10] sm:$0xff] %v226_v57  ;;  %v317_v4 = vmul.f32 %v862_v19, %v939_v47  ;;  %v318_v6 = vmul.f32 %v862_v19, %v971_v13 }
  0x9a   :  { %243 = vst [vmem:[#allocation7 + $0x28] sm:$0xff] %v239_v7  ;;  %257 = vst [vmem:[#allocation7 + $0x40] sm:$0xff] %v253_v58  ;;  %v330_v9 = vmul.f32 %v868_v21, %v913_v37  ;;  %v331_v11 = vmul.f32 %v868_v21, %v939_v47  ;;  %v309_v14 = vadd.f32 %v859_v18, %v304_v15 }
  0x9b   :  { %271 = vst [vmem:[#allocation7 + $0x58] sm:$0xff] %v267_v10  ;;  %285 = vst [vmem:[#allocation7 + $0x70] sm:$0xff] %v281_v59  ;;  %v321_v16 = vadd.f32 %v865_v20, %v316_v60  ;;  %v332_v17 = vmul.f32 %v868_v21, %v971_v13  ;;  %v344_v62 = vmul.f32 %v874_v23, %v913_v37 }
  0x9c   :  { %299 = vst [vmem:[#allocation7 + $0x88] sm:$0xff] %v295_v12  ;;  %v322_v19 = vadd.f32 %v865_v20, %v317_v4  ;;  %v323_v63 = vadd.f32 %v865_v20, %v318_v6  ;;  %v335_v0 = vadd.f32 %v871_v22, %v330_v9  ;;  %v336_v1 = vadd.f32 %v871_v22, %v331_v11 }
  0x9d   :  { %313 = vst [vmem:[#allocation7 + $0xa0] sm:$0xff] %v309_v14  ;;  %325 = vst [vmem:[#allocation7 + $0xa8] sm:$0xff] %v321_v16  ;;  %v337_v18 = vadd.f32 %v871_v22, %v332_v17  ;;  %v349_v2 = vadd.f32 %v877_v24, %v344_v62  ;;  %v345_v21 = vmul.f32 %v874_v23, %v939_v47 }
  0x9e   :  { %v346_v8 = vmul.f32 %v874_v23, %v971_v13  ;;  %326 = vst [vmem:[#allocation7 + $0xb0] sm:$0xff] %v322_v19  ;;  %327 = vst [vmem:[#allocation7 + $0xb8] sm:$0xff] %v323_v63  ;;  %v358_v20 = vmul.f32 %v880_v25, %v913_v37  ;;  %v359_v32 = vmul.f32 %v880_v25, %v939_v47 }
  0x9f   :  { %339 = vst [vmem:[#allocation7 + $0xc0] sm:$0xff] %v335_v0  ;;  %340 = vst [vmem:[#allocation7 + $0xc8] sm:$0xff] %v336_v1  ;;  %v360_v22 = vmul.f32 %v880_v25, %v971_v13  ;;  %v372_v41 = vmul.f32 %v886_v27, %v913_v37  ;;  %v350_v23 = vadd.f32 %v877_v24, %v345_v21 }
  0xa0   :  { %341 = vst [vmem:[#allocation7 + $0xd0] sm:$0xff] %v337_v18  ;;  %353 = vst [vmem:[#allocation7 + $0xd8] sm:$0xff] %v349_v2  ;;  %v351_v46 = vadd.f32 %v877_v24, %v346_v8  ;;  %v373_v48 = vmul.f32 %v886_v27, %v939_v47  ;;  %v374_v49 = vmul.f32 %v886_v27, %v971_v13 }
  0xa1   :  { %v363_v50 = vadd.f32 %v883_v26, %v358_v20  ;;  %v364_v61 = vadd.f32 %v883_v26, %v359_v32  ;;  %v365_v25 = vadd.f32 %v883_v26, %v360_v22  ;;  %v377_v51 = vadd.f32 %v889_v28, %v372_v41  ;;  %354 = vst [vmem:[#allocation7 + $0xe0] sm:$0xff] %v350_v23 }
  0xa2   :  { %355 = vst [vmem:[#allocation7 + $0xe8] sm:$0xff] %v351_v46  ;;  %v378_v54 = vadd.f32 %v889_v28, %v373_v48  ;;  %v379_v24 = vadd.f32 %v889_v28, %v374_v49  ;;  %v386_v52 = vmul.f32 %v892_v29, %v913_v37  ;;  %v387_v27 = vmul.f32 %v892_v29, %v939_v47 }
  0xa3   :  { %367 = vst [vmem:[#allocation7 + $0xf0] sm:$0xff] %v363_v50  ;;  %368 = vst [vmem:[#allocation7 + $0xf8] sm:$0xff] %v364_v61  ;;  %v388_v26 = vmul.f32 %v892_v29, %v971_v13  ;;  %v400_v55 = vmul.f32 %v898_v31, %v913_v37  ;;  %v401_v53 = vmul.f32 %v898_v31, %v939_v47 }
  0xa4   :  { %369 = vst [vmem:[#allocation7 + $0x100] sm:$0xff] %v365_v25  ;;  %381 = vst [vmem:[#allocation7 + $0x108] sm:$0xff] %v377_v51  ;;  %v402_v28 = vmul.f32 %v898_v31, %v971_v13  ;;  %v391_v56 = vadd.f32 %v895_v30, %v386_v52  ;;  %v392_v3 = vadd.f32 %v895_v30, %v387_v27 }
  0xa5   :  { %382 = vst [vmem:[#allocation7 + $0x110] sm:$0xff] %v378_v54  ;;  %383 = vst [vmem:[#allocation7 + $0x118] sm:$0xff] %v379_v24  ;;  %v414_v5 = vmul.f32 %v904_v34, %v913_v37  ;;  %v415_v29 = vmul.f32 %v904_v34, %v939_v47  ;;  %v393_v57 = vadd.f32 %v895_v30, %v388_v26 }
  0xa6   :  { %v405_v7 = vadd.f32 %v901_v33, %v400_v55  ;;  %v406_v58 = vadd.f32 %v901_v33, %v401_v53  ;;  %v407_v31 = vadd.f32 %v901_v33, %v402_v28  ;;  %395 = vst [vmem:[#allocation7 + $0x120] sm:$0xff] %v391_v56  ;;  %396 = vst [vmem:[#allocation7 + $0x128] sm:$0xff] %v392_v3 }
  0xa7   :  { %v419_v10 = vadd.f32 %v907_v35, %v414_v5  ;;  %v420_v59 = vadd.f32 %v907_v35, %v415_v29  ;;  %v416_v12 = vmul.f32 %v904_v34, %v971_v13  ;;  %v428_v15 = vmul.f32 %v910_v36, %v913_v37  ;;  %397 = vst [vmem:[#allocation7 + $0x130] sm:$0xff] %v393_v57 }
  0xa8   :  { %409 = vst [vmem:[#allocation7 + $0x138] sm:$0xff] %v405_v7  ;;  %410 = vst [vmem:[#allocation7 + $0x140] sm:$0xff] %v406_v58  ;;  %v429_v30 = vmul.f32 %v910_v36, %v939_v47  ;;  %v430_v33 = vmul.f32 %v910_v36, %v971_v13  ;;  %v442_v60 = vmul.f32 %v919_v39, %v913_v37 }
  0xa9   :  { %411 = vst [vmem:[#allocation7 + $0x148] sm:$0xff] %v407_v31  ;;  %v443_v4 = vmul.f32 %v919_v39, %v939_v47  ;;  %423 = vst [vmem:[#allocation7 + $0x150] sm:$0xff] %v419_v10  ;;  %v421_v34 = vadd.f32 %v907_v35, %v416_v12  ;;  %v433_v6 = vadd.f32 %v916_v38, %v428_v15 }
  0xaa   :  { %424 = vst [vmem:[#allocation7 + $0x158] sm:$0xff] %v420_v59  ;;  %v444_v9 = vmul.f32 %v919_v39, %v971_v13  ;;  %v456_v11 = vmul.f32 %v925_v42, %v913_v37  ;;  %v434_v36 = vadd.f32 %v916_v38, %v429_v30  ;;  %v435_v14 = vadd.f32 %v916_v38, %v430_v33 }
  0xab   :  { %v447_v16 = vadd.f32 %v922_v40, %v442_v60  ;;  %v448_v17 = vadd.f32 %v922_v40, %v443_v4  ;;  %425 = vst [vmem:[#allocation7 + $0x160] sm:$0xff] %v421_v34  ;;  %437 = vst [vmem:[#allocation7 + $0x168] sm:$0xff] %v433_v6  ;;  %v457_v39 = vmul.f32 %v925_v42, %v939_v47 }
  0xac   :  { %v449_v35 = vadd.f32 %v922_v40, %v444_v9  ;;  %v461_v62 = vadd.f32 %v928_v43, %v456_v11  ;;  %v458_v19 = vmul.f32 %v925_v42, %v971_v13  ;;  %438 = vst [vmem:[#allocation7 + $0x170] sm:$0xff] %v434_v36  ;;  %439 = vst [vmem:[#allocation7 + $0x178] sm:$0xff] %v435_v14 }
  0xad   :  { %451 = vst [vmem:[#allocation7 + $0x180] sm:$0xff] %v447_v16  ;;  %452 = vst [vmem:[#allocation7 + $0x188] sm:$0xff] %v448_v17  ;;  %v470_v38 = vmul.f32 %v931_v44, %v913_v37  ;;  %v471_v40 = vmul.f32 %v931_v44, %v939_v47  ;;  %v472_v63 = vmul.f32 %v931_v44, %v971_v13 }
  0xae   :  { %453 = vst [vmem:[#allocation7 + $0x190] sm:$0xff] %v449_v35  ;;  %465 = vst [vmem:[#allocation7 + $0x198] sm:$0xff] %v461_v62  ;;  %v462_v0 = vadd.f32 %v928_v43, %v457_v39  ;;  %v463_v42 = vadd.f32 %v928_v43, %v458_v19 }
  0xaf   :  { %v475_v1 = vadd.f32 %v934_v45, %v470_v38  ;;  %v476_v18 = vadd.f32 %v934_v45, %v471_v40  ;;  %v477_v2 = vadd.f32 %v934_v45, %v472_v63 }
  0xb0   :  { %466 = vst [vmem:[#allocation7 + $0x1a0] sm:$0xff] %v462_v0  ;;  %467 = vst [vmem:[#allocation7 + $0x1a8] sm:$0xff] %v463_v42 }
  0xb1   :  { %479 = vst [vmem:[#allocation7 + $0x1b0] sm:$0xff] %v475_v1  ;;  %480 = vst [vmem:[#allocation7 + $0x1b8] sm:$0xff] %v476_v18 }
  0xb2   :  { %481 = vst [vmem:[#allocation7 + $0x1c0] sm:$0xff] %v477_v2 }
  0xb3   :  { %673 = shalt.err (!%p670_p1)
}
  0xb4   :  { %s1138_s25 = sld [smem:[#allocation15_spill]] }
  0xba   :  { %s674_s26 = scalar_lea.hbm %s1138_s25, 7296 }
  0xbb   :  { %p675_p2 = scmp.ne.s32.totalorder %s1138_s25, %s674_s26  ;;  %p678_p3 = scmp.lt.u32.totalorder %s674_s26, %s1138_s25 }
  0xbd   :  { %p680_p4 = pnand %p678_p3, %p675_p2 }
  0xbf   :  { %683 = shalt.err (!%p680_p4)
}
  0xc0   :  { %s693_s30 = smov 384   ;;  %s694_s3 = smov 24  }
  0xc1   :  { %493 = dma.vmem_to_hbm [thread:$0]  %s488_s21, 7296, %s1138_s25, [#allocation4], %s693_s30, %s693_s30, %s694_s3  }
  0xc2   :  { %688 = dma.done.wait [#allocation4], 7296  }
  0xc3   :  { %689 = vsyncadd [#allocation4], 4294960000 }
  0xc4   :  { %497 = vsyncpa [#allocation3], 1 }
  0xc5   :  { %498 = vsyncpa [#allocation4], 1 }
  0xc6   :  { %499 = vsyncpa [#allocation5], 1 }

</bundles_post_ra>
